<compile_context>
chip_gen: v7x
topology: tpu7x:2x2x1
jax: 0.10.0
libtpu: 0.0.40
codegen_flags: <defaults>
</compile_context>

<pallas_src>
import math
import functools

import jax
import jax.numpy as jnp
from jax import lax
from jax.experimental import pallas as pl
from jax.experimental.pallas import tpu as pltpu


_NEG_FILL = -1e30  # finite mask fill (no exp(-inf - -inf) -> NaN hazard)


# ---------------------------------------------------------------------------
# Kernel 1: ln_1 + fused QKV projection.  grid = (B, T//TT)
#   One wide (TT,C)x(C,3C) matmul; output is a lane-dense (B,T,3C) bf16 slab
#   (q | k | v, heads contiguous inside each C chunk).  q pre-scaled by
#   1/sqrt(D) via host-side weight folding.
# ---------------------------------------------------------------------------
def _ln_qkv_kernel(x_ref, g_ref, b_ref, w_ref, bias_ref, qkv_ref, *, eps):
    x = x_ref[0].astype(jnp.float32)                          # (TT, C)
    mu = jnp.mean(x, axis=-1, keepdims=True)
    xc = x - mu
    var = jnp.mean(xc * xc, axis=-1, keepdims=True)
    xn = xc * lax.rsqrt(var + eps) * g_ref[...] + b_ref[...]
    qkv = jnp.dot(xn.astype(w_ref.dtype), w_ref[...],
                  preferred_element_type=jnp.float32) + bias_ref[...]
    qkv_ref[0] = qkv.astype(qkv_ref.dtype)


# ---------------------------------------------------------------------------
# Kernel 2: flash-style causal attention over a flattened grid of only the
#   valid (q_block, kv_block) pairs.  grid = (B, H, n_pairs); the pair tables
#   are scalar-prefetched into SMEM and drive every index_map.
#   Output: per-head attention result packed into (B, T, C) bf16.
# ---------------------------------------------------------------------------
def _flash_attn_kernel(qi_map_ref, kv_map_ref, q_ref, k_ref, v_ref, o_ref,
                       m_sc, l_sc, acc_sc, *, block_q, block_k):
    p = pl.program_id(2)
    qi = qi_map_ref[p]
    kv = kv_map_ref[p]
    q_start = qi * block_q
    kv_start = kv * block_k

    @pl.when(kv == 0)                       # first KV block of this query block
    def _():
        m_sc[...] = jnp.full_like(m_sc, -jnp.inf)
        l_sc[...] = jnp.zeros_like(l_sc)
        acc_sc[...] = jnp.zeros_like(acc_sc)

    qb = q_ref[0]                           # (TQ, D) bf16, pre-scaled by 1/sqrt(D)
    kb = k_ref[0]                           # (TK, D) bf16
    vb = v_ref[0]                           # (TK, D) bf16
    s = lax.dot_general(qb, kb, (((1,), (1,)), ((), ())),
                        preferred_element_type=jnp.float32)   # (TQ, TK) f32

    def _online_update(scores):
        m_prev = m_sc[...]
        m_new = jnp.maximum(m_prev, jnp.max(scores, axis=-1, keepdims=True))
        alpha = jnp.exp(m_prev - m_new)
        pmat = jnp.exp(scores - m_new)      # masked entries (-1e30) underflow to 0
        l_sc[...] = alpha * l_sc[...] + jnp.sum(pmat, axis=-1, keepdims=True)
        acc_sc[...] = alpha * acc_sc[...] + jnp.dot(
            pmat.astype(vb.dtype), vb, preferred_element_type=jnp.float32)
        m_sc[...] = m_new

    # Only blocks that touch the diagonal need masking.
    on_diag = (kv_start + (block_k - 1)) > q_start

    @pl.when(on_diag)
    def _():
        col = kv_start + lax.broadcasted_iota(jnp.int32, (block_q, block_k), 1)
        row = q_start + lax.broadcasted_iota(jnp.int32, (block_q, 1), 0)
        _online_update(jnp.where(col <= row, s, _NEG_FILL))

    @pl.when(jnp.logical_not(on_diag))
    def _():
        _online_update(s)

    # Last valid KV block for this query block (TQ == TK => kv == qi).
    @pl.when(kv == qi)
    def _():
        o_ref[0] = (acc_sc[...] / l_sc[...]).astype(o_ref.dtype)


# ---------------------------------------------------------------------------
# Kernel 3: c_proj (K=C contraction) + residual + ln_2 + MLP + residual,
#   with the 4C hidden dim tiled as a reduction grid axis.
#   grid = (B, T//TT, 4C//TH)
# ---------------------------------------------------------------------------
def _proj_mlp_kernel(x_ref, y_ref, wp_ref, bp_ref, g_ref, b_ref,
                     w1_ref, b1_ref, w2_ref, b2_ref, o_ref,
                     x1_sc, xn2_sc, acc_sc, *, eps):
    k = pl.program_id(2)

    @pl.when(k == 0)
    def _():
        x = x_ref[0].astype(jnp.float32)                      # (TT, C)
        x1 = x + jnp.dot(y_ref[0], wp_ref[...],
                         preferred_element_type=jnp.float32) + bp_ref[...]
        x1_sc[...] = x1
        mu = jnp.mean(x1, axis=-1, keepdims=True)
        xc = x1 - mu
        var = jnp.mean(xc * xc, axis=-1, keepdims=True)
        xn = xc * lax.rsqrt(var + eps) * g_ref[...] + b_ref[...]
        xn2_sc[...] = xn.astype(xn2_sc.dtype)
        acc_sc[...] = jnp.zeros_like(acc_sc)

    h = jnp.dot(xn2_sc[...], w1_ref[...],
                preferred_element_type=jnp.float32) + b1_ref[...]
    h = jnp.maximum(h, 0.0)                                   # ReLU
    acc_sc[...] += jnp.dot(h.astype(w2_ref.dtype), w2_ref[...],
                           preferred_element_type=jnp.float32)

    @pl.when(k == pl.num_programs(2) - 1)
    def _():
        o_ref[0] = (x1_sc[...] + acc_sc[...] + b2_ref[...]).astype(o_ref.dtype)


# ---------------------------------------------------------------------------
# Wrapper
# ---------------------------------------------------------------------------
def block_forward(x, params, *, n_head, eps=1e-5,
                  block_q=128, block_k=128, block_t=256, hidden_block=512,
                  single_buffer_consts=True):
    B, T, C = x.shape
    assert C % n_head == 0
    H = n_head
    D = C // H

    TQ = min(block_q, T)
    TK = min(block_k, T)
    TT = min(block_t, T)
    assert TQ == TK, "attention kernel assumes square score tiles"
    assert T % TQ == 0 and T % TT == 0
    HID = 4 * C
    TH = min(hidden_block, HID)
    assert HID % TH == 0

    f32, bf16 = jnp.float32, jnp.bfloat16

    def const_spec(shape, index_map):
        # Constant-index block: a single VMEM buffer is enough.
        if single_buffer_consts:
            try:
                return pl.BlockSpec(shape, index_map, pipeline_mode=pl.Buffered(1))
            except (TypeError, AttributeError):
                pass
        return pl.BlockSpec(shape, index_map)

    # ---- host-side parameter prep: bf16 MXU operands, f32 biases/affines ----
    # Fold 1/sqrt(D) into the q-columns of the QKV projection.
    qkv_scale = jnp.concatenate(
        [jnp.full((C,), 1.0 / math.sqrt(D), f32), jnp.ones((2 * C,), f32)])
    w_qkv = (params["w_qkv"].astype(f32) * qkv_scale[None, :]).astype(bf16)  # (C, 3C)
    b_qkv = (params["b_qkv"].astype(f32) * qkv_scale).reshape(1, 3 * C)      # (1, 3C)

    w_proj = params["w_proj"].astype(bf16)                                   # (C, C)
    b_proj = params["b_proj"].reshape(1, C).astype(f32)

    ln1_g = params["ln1_g"].reshape(1, C).astype(f32)
    ln1_b = params["ln1_b"].reshape(1, C).astype(f32)
    ln2_g = params["ln2_g"].reshape(1, C).astype(f32)
    ln2_b = params["ln2_b"].reshape(1, C).astype(f32)

    w1 = params["w1"].astype(bf16)                                           # (C, 4C)
    b1 = params["b1"].reshape(1, HID).astype(f32)
    w2 = params["w2"].astype(bf16)                                           # (4C, C)
    b2 = params["b2"].reshape(1, C).astype(f32)

    # VMEM budget ~75% of physical (v7x 64 MiB -> 48 MiB, v5e/v6e 128 MiB -> 96 MiB).
    try:
        vmem_limit = int(0.75 * pltpu.get_tpu_info().vmem_capacity_bytes)
    except Exception:
        vmem_limit = 48 * 1024 * 1024

    # ---- kernel 1: ln_1 + fused QKV -> qkv slab (B, T, 3C) bf16 -------------
    qkv = pl.pallas_call(
        functools.partial(_ln_qkv_kernel, eps=eps),
        out_shape=jax.ShapeDtypeStruct((B, T, 3 * C), bf16),
        grid_spec=pltpu.PrefetchScalarGridSpec(
            num_scalar_prefetch=0,
            grid=(B, T // TT),
            in_specs=[
                pl.BlockSpec((1, TT, C), lambda b, t: (b, t, 0)),     # x
                const_spec((1, C), lambda b, t: (0, 0)),              # ln1 gamma
                const_spec((1, C), lambda b, t: (0, 0)),              # ln1 beta
                const_spec((C, 3 * C), lambda b, t: (0, 0)),          # W_qkv (q pre-scaled)
                const_spec((1, 3 * C), lambda b, t: (0, 0)),          # b_qkv
            ],
            out_specs=pl.BlockSpec((1, TT, 3 * C), lambda b, t: (b, t, 0)),
        ),
        compiler_params=pltpu.CompilerParams(
            dimension_semantics=("parallel", "parallel"),
            vmem_limit_bytes=vmem_limit),
    )(x, ln1_g, ln1_b, w_qkv, b_qkv)

    # ---- kernel 2: flash attention over valid causal block pairs ------------
    n_q = T // TQ
    pair_qi, pair_kv = [], []
    for qi in range(n_q):                 # TQ == TK -> valid kv blocks are 0..qi
        for kv in range(qi + 1):
            pair_qi.append(qi)
            pair_kv.append(kv)
    n_pairs = len(pair_qi)
    qi_map = jnp.asarray(pair_qi, dtype=jnp.int32)
    kv_map = jnp.asarray(pair_kv, dtype=jnp.int32)

    y = pl.pallas_call(
        functools.partial(_flash_attn_kernel, block_q=TQ, block_k=TK),
        out_shape=jax.ShapeDtypeStruct((B, T, C), bf16),
        grid_spec=pltpu.PrefetchScalarGridSpec(
            num_scalar_prefetch=2,
            grid=(B, H, n_pairs),
            in_specs=[
                # q / k / v are D-wide column blocks of the same qkv slab.
                pl.BlockSpec((1, TQ, D),
                             lambda b, h, p, qi_m, kv_m: (b, qi_m[p], h)),
                pl.BlockSpec((1, TK, D),
                             lambda b, h, p, qi_m, kv_m: (b, kv_m[p], H + h)),
                pl.BlockSpec((1, TK, D),
                             lambda b, h, p, qi_m, kv_m: (b, kv_m[p], 2 * H + h)),
            ],
            out_specs=pl.BlockSpec((1, TQ, D),
                                   lambda b, h, p, qi_m, kv_m: (b, qi_m[p], h)),
            scratch_shapes=[
                pltpu.VMEM((TQ, 1), jnp.float32),   # m (online-softmax max)
                pltpu.VMEM((TQ, 1), jnp.float32),   # l (online-softmax sum)
                pltpu.VMEM((TQ, D), jnp.float32),   # PV accumulator
            ],
        ),
        compiler_params=pltpu.CompilerParams(
            dimension_semantics=("parallel", "parallel", "arbitrary"),
            vmem_limit_bytes=vmem_limit),
    )(qi_map, kv_map, qkv, qkv, qkv)

    # ---- kernel 3: c_proj + residual + ln_2 + MLP (4C tiled) + residual -----
    out = pl.pallas_call(
        functools.partial(_proj_mlp_kernel, eps=eps),
        out_shape=jax.ShapeDtypeStruct((B, T, C), x.dtype),
        grid_spec=pltpu.PrefetchScalarGridSpec(
            num_scalar_prefetch=0,
            grid=(B, T // TT, HID // TH),
            in_specs=[
                pl.BlockSpec((1, TT, C), lambda b, t, k: (b, t, 0)),   # residual x
                pl.BlockSpec((1, TT, C), lambda b, t, k: (b, t, 0)),   # attention y
                const_spec((C, C), lambda b, t, k: (0, 0)),            # W_proj
                const_spec((1, C), lambda b, t, k: (0, 0)),            # b_proj
                const_spec((1, C), lambda b, t, k: (0, 0)),            # ln2 gamma
                const_spec((1, C), lambda b, t, k: (0, 0)),            # ln2 beta
                pl.BlockSpec((C, TH), lambda b, t, k: (0, k)),         # w1 chunk
                pl.BlockSpec((1, TH), lambda b, t, k: (0, k)),         # b1 chunk
                pl.BlockSpec((TH, C), lambda b, t, k: (k, 0)),         # w2 chunk
                const_spec((1, C), lambda b, t, k: (0, 0)),            # b2
            ],
            out_specs=pl.BlockSpec((1, TT, C), lambda b, t, k: (b, t, 0)),
            scratch_shapes=[
                pltpu.VMEM((TT, C), jnp.float32),   # x1 = x + attn (residual carrier)
                pltpu.VMEM((TT, C), bf16),          # ln2(x1) MXU operand
                pltpu.VMEM((TT, C), jnp.float32),   # MLP output accumulator
            ],
        ),
        compiler_params=pltpu.CompilerParams(
            dimension_semantics=("parallel", "parallel", "arbitrary"),
            vmem_limit_bytes=vmem_limit),
    )(x, y, w_proj, b_proj, ln2_g, ln2_b, w1, b1, w2, b2)

    return out


# ---------------------------------------------------------------------------
# Pure-JAX reference (fp32)
# ---------------------------------------------------------------------------
def _layernorm_ref(x, g, b, eps=1e-5):
    mu = jnp.mean(x, axis=-1, keepdims=True)
    var = jnp.mean((x - mu) ** 2, axis=-1, keepdims=True)
    return (x - mu) / jnp.sqrt(var + eps) * g + b


def _block_reference(x, p, n_head, eps=1e-5):
    B, T, C = x.shape
    D = C // n_head
    xn = _layernorm_ref(x, p["ln1_g"], p["ln1_b"], eps)
    qkv = xn @ p["w_qkv"] + p["b_qkv"]
    q, k, v = jnp.split(qkv, 3, axis=-1)

    def heads(t):
        return t.reshape(B, T, n_head, D).transpose(0, 2, 1, 3)

    q, k, v = heads(q), heads(k), heads(v)
    s = jnp.einsum("bhqd,bhkd->bhqk", q, k) / math.sqrt(D)
    mask = jnp.tril(jnp.ones((T, T), dtype=bool))
    s = jnp.where(mask, s, -jnp.inf)
    pw = jax.nn.softmax(s, axis=-1)
    y = jnp.einsum("bhqk,bhkd->bhqd", pw, v)
    y = y.transpose(0, 2, 1, 3).reshape(B, T, C)
    x = x + y @ p["w_proj"] + p["b_proj"]
    xn2 = _layernorm_ref(x, p["ln2_g"], p["ln2_b"], eps)
    h = jnp.maximum(xn2 @ p["w1"] + p["b1"], 0.0)
    return x + h @ p["w2"] + p["b2"]


if __name__ == "__main__":
    B, T = 2, 32
    n_embd, n_head = 32, 4
    dtype = jnp.float32

    key = jax.random.PRNGKey(0)
    ks = jax.random.split(key, 13)

    x = jax.random.normal(ks[0], (B, T, n_embd), dtype=dtype)
    params = {
        # nn.Linear stores (out, in); here we keep the transposed (in, out) layout.
        "w_qkv": 0.02 * jax.random.normal(ks[1], (n_embd, 3 * n_embd), dtype=dtype),
        "b_qkv": 0.01 * jax.random.normal(ks[2], (3 * n_embd,), dtype=dtype),
        "w_proj": 0.02 * jax.random.normal(ks[3], (n_embd, n_embd), dtype=dtype),
        "b_proj": 0.01 * jax.random.normal(ks[4], (n_embd,), dtype=dtype),
        "ln1_g": 1.0 + 0.1 * jax.random.normal(ks[5], (n_embd,), dtype=dtype),
        "ln1_b": 0.01 * jax.random.normal(ks[6], (n_embd,), dtype=dtype),
        "ln2_g": 1.0 + 0.1 * jax.random.normal(ks[7], (n_embd,), dtype=dtype),
        "ln2_b": 0.01 * jax.random.normal(ks[8], (n_embd,), dtype=dtype),
        "w1": 0.02 * jax.random.normal(ks[9], (n_embd, 4 * n_embd), dtype=dtype),
        "b1": 0.01 * jax.random.normal(ks[10], (4 * n_embd,), dtype=dtype),
        "w2": 0.02 * jax.random.normal(ks[11], (4 * n_embd, n_embd), dtype=dtype),
        "b2": 0.01 * jax.random.normal(ks[12], (n_embd,), dtype=dtype),
    }

    # Small blocks so the multi-block online-softmax path, the causal pair-skip
    # tables, diagonal vs. full block handling, and MLP hidden tiling are all
    # exercised (4 q-blocks x up to 4 kv-blocks, 4 hidden chunks).
    kwargs = dict(n_head=n_head, block_q=8, block_k=8, block_t=8, hidden_block=32)
    try:
        out = jax.block_until_ready(block_forward(x, params, **kwargs))
    except Exception:
        # Fallback in case this jax build rejects pipeline_mode=pl.Buffered(1).
        out = jax.block_until_ready(
            block_forward(x, params, single_buffer_consts=False, **kwargs))

    ref = _block_reference(x, params, n_head)
    assert out.shape == (B, T, n_embd)
    max_err = float(jnp.max(jnp.abs(out - ref)))
    # bf16 MXU operands -> looser tolerance than pure fp32.
    assert jnp.allclose(out, ref, atol=2e-2, rtol=2e-2), f"mismatch: max_abs_err={max_err}"

    print("KERNEL_OK")
</pallas_src>

<mosaic_0001>
module attributes {stable_mosaic.version = 11 : i64} {
  func.func @_ln_qkv_kernel(%arg0: i32, %arg1: i32, %arg2: memref<1x8x32xf32, #tpu.memory_space<vmem>>, %arg3: memref<1x32xf32, #tpu.memory_space<vmem>>, %arg4: memref<1x32xf32, #tpu.memory_space<vmem>>, %arg5: memref<32x96xbf16, #tpu.memory_space<vmem>>, %arg6: memref<1x96xf32, #tpu.memory_space<vmem>>, %arg7: memref<1x8x96xbf16, #tpu.memory_space<vmem>>) attributes {dimension_semantics = [#tpu.dimension_semantics<parallel>, #tpu.dimension_semantics<parallel>], iteration_bounds = array<i64: 2, 4>, scalar_prefetch = 0 : i64, scratch_operands = 0 : i64, tpu.core_type = #tpu.core_type<tc>, window_params = [{transform_indices = @transform_0, window_bounds = array<i64: 1, 8, 32>}, {pipeline_mode = #tpu.pipeline_mode<synchronous>, transform_indices = @transform_1, window_bounds = array<i64: 1, 32>}, {pipeline_mode = #tpu.pipeline_mode<synchronous>, transform_indices = @transform_2, window_bounds = array<i64: 1, 32>}, {pipeline_mode = #tpu.pipeline_mode<synchronous>, transform_indices = @transform_3, window_bounds = array<i64: 32, 96>}, {pipeline_mode = #tpu.pipeline_mode<synchronous>, transform_indices = @transform_4, window_bounds = array<i64: 1, 96>}, {transform_indices = @transform_5, window_bounds = array<i64: 1, 8, 96>}]} {
    %c0 = arith.constant 0 : index
    %c0_0 = arith.constant 0 : index
    %c0_1 = arith.constant 0 : index
    %0 = vector.load %arg2[%c0, %c0_0, %c0_1] : memref<1x8x32xf32, #tpu.memory_space<vmem>>, vector<1x8x32xf32>
    %1 = vector.shape_cast %0 : vector<1x8x32xf32> to vector<8x32xf32>
    %cst = arith.constant dense<0.000000e+00> : vector<8xf32>
    %2 = vector.multi_reduction <add>, %1, %cst [1] : vector<8x32xf32> to vector<8xf32>
    %3 = vector.shape_cast %2 : vector<8xf32> to vector<8x1xf32>
    %cst_2 = arith.constant 3.200000e+01 : f32
    %4 = vector.broadcast %cst_2 : f32 to vector<8x1xf32>
    %5 = arith.divf %3, %4 : vector<8x1xf32>
    %6 = vector.broadcast %5 : vector<8x1xf32> to vector<8x32xf32>
    %7 = arith.subf %1, %6 : vector<8x32xf32>
    %8 = arith.mulf %7, %7 : vector<8x32xf32>
    %cst_3 = arith.constant dense<0.000000e+00> : vector<8xf32>
    %9 = vector.multi_reduction <add>, %8, %cst_3 [1] : vector<8x32xf32> to vector<8xf32>
    %10 = vector.shape_cast %9 : vector<8xf32> to vector<8x1xf32>
    %cst_4 = arith.constant 3.200000e+01 : f32
    %11 = vector.broadcast %cst_4 : f32 to vector<8x1xf32>
    %12 = arith.divf %10, %11 : vector<8x1xf32>
    %cst_5 = arith.constant 9.99999974E-6 : f32
    %13 = vector.broadcast %cst_5 : f32 to vector<8x1xf32>
    %14 = arith.addf %12, %13 : vector<8x1xf32>
    %15 = math.rsqrt %14 : vector<8x1xf32>
    %16 = vector.broadcast %15 : vector<8x1xf32> to vector<8x32xf32>
    %17 = arith.mulf %7, %16 : vector<8x32xf32>
    %c0_6 = arith.constant 0 : index
    %c0_7 = arith.constant 0 : index
    %18 = vector.load %arg3[%c0_6, %c0_7] : memref<1x32xf32, #tpu.memory_space<vmem>>, vector<1x32xf32>
    %19 = vector.broadcast %18 : vector<1x32xf32> to vector<8x32xf32>
    %20 = arith.mulf %17, %19 : vector<8x32xf32>
    %c0_8 = arith.constant 0 : index
    %c0_9 = arith.constant 0 : index
    %21 = vector.load %arg4[%c0_8, %c0_9] : memref<1x32xf32, #tpu.memory_space<vmem>>, vector<1x32xf32>
    %22 = vector.broadcast %21 : vector<1x32xf32> to vector<8x32xf32>
    %23 = arith.addf %20, %22 : vector<8x32xf32>
    %24 = arith.truncf %23 : vector<8x32xf32> to vector<8x32xbf16>
    %c0_10 = arith.constant 0 : index
    %c0_11 = arith.constant 0 : index
    %25 = vector.load %arg5[%c0_10, %c0_11] : memref<32x96xbf16, #tpu.memory_space<vmem>>, vector<32x96xbf16>
    %cst_12 = arith.constant dense<0.000000e+00> : vector<8x96xf32>
    %26 = tpu.matmul %24, %25, %cst_12 {dimension_numbers = #tpu.dot_dimension_numbers<[1], [0], [0], [1], [0, 0, 1, 1], [], []>} : vector<8x32xbf16>, vector<32x96xbf16>, vector<8x96xf32> -> vector<8x96xf32>
    %c0_13 = arith.constant 0 : index
    %c0_14 = arith.constant 0 : index
    %27 = vector.load %arg6[%c0_13, %c0_14] : memref<1x96xf32, #tpu.memory_space<vmem>>, vector<1x96xf32>
    %28 = vector.broadcast %27 : vector<1x96xf32> to vector<8x96xf32>
    %29 = arith.addf %26, %28 : vector<8x96xf32>
    %30 = arith.truncf %29 : vector<8x96xf32> to vector<8x96xbf16>
    %c0_15 = arith.constant 0 : index
    %c0_16 = arith.constant 0 : index
    %c0_17 = arith.constant 0 : index
    %31 = vector.load %arg7[%c0_15, %c0_16, %c0_17] : memref<1x8x96xbf16, #tpu.memory_space<vmem>>, vector<1x8x96xbf16>
    %32 = vector.shape_cast %31 : vector<1x8x96xbf16> to vector<8x96xbf16>
    %33 = vector.shape_cast %30 : vector<8x96xbf16> to vector<1x8x96xbf16>
    tpu.vector_store %arg7[%c0_15, %c0_16, %c0_17], %33 {strides = array<i32>} : memref<1x8x96xbf16, #tpu.memory_space<vmem>>, vector<1x8x96xbf16>,
    return
  }
  func.func @transform_0(%arg0: i32, %arg1: i32) -> (i32, i32, i32) {
    %c0_i32 = arith.constant 0 : i32
    %c0_i32_0 = arith.constant 0 : i32
    return %arg0, %arg1, %c0_i32 : i32, i32, i32
  }
  func.func @transform_1(%arg0: i32, %arg1: i32) -> (i32, i32) {
    %c0_i32 = arith.constant 0 : i32
    %c0_i32_0 = arith.constant 0 : i32
    %c0_i32_1 = arith.constant 0 : i32
    return %c0_i32, %c0_i32_0 : i32, i32
  }
  func.func @transform_2(%arg0: i32, %arg1: i32) -> (i32, i32) {
    %c0_i32 = arith.constant 0 : i32
    %c0_i32_0 = arith.constant 0 : i32
    %c0_i32_1 = arith.constant 0 : i32
    return %c0_i32, %c0_i32_0 : i32, i32
  }
  func.func @transform_3(%arg0: i32, %arg1: i32) -> (i32, i32) {
    %c0_i32 = arith.constant 0 : i32
    %c0_i32_0 = arith.constant 0 : i32
    %c0_i32_1 = arith.constant 0 : i32
    return %c0_i32, %c0_i32_0 : i32, i32
  }
  func.func @transform_4(%arg0: i32, %arg1: i32) -> (i32, i32) {
    %c0_i32 = arith.constant 0 : i32
    %c0_i32_0 = arith.constant 0 : i32
    %c0_i32_1 = arith.constant 0 : i32
    return %c0_i32, %c0_i32_0 : i32, i32
  }
  func.func @transform_5(%arg0: i32, %arg1: i32) -> (i32, i32, i32) {
    %c0_i32 = arith.constant 0 : i32
    %c0_i32_0 = arith.constant 0 : i32
    return %arg0, %arg1, %c0_i32 : i32, i32, i32
  }
}

module attributes {stable_mosaic.version = 11 : i64} {
  func.func @_ln_qkv_kernel(%arg0: i32, %arg1: i32, %arg2: memref<1x8x32xf32, #tpu.memory_space<vmem>>, %arg3: memref<1x32xf32, #tpu.memory_space<vmem>>, %arg4: memref<1x32xf32, #tpu.memory_space<vmem>>, %arg5: memref<32x96xbf16, #tpu.memory_space<vmem>>, %arg6: memref<1x96xf32, #tpu.memory_space<vmem>>, %arg7: memref<1x8x96xbf16, #tpu.memory_space<vmem>>) attributes {dimension_semantics = [#tpu.dimension_semantics<parallel>, #tpu.dimension_semantics<parallel>], iteration_bounds = array<i64: 2, 4>, scalar_prefetch = 0 : i64, scratch_operands = 0 : i64, tpu.core_type = #tpu.core_type<tc>, window_params = [{transform_indices = @transform_0, window_bounds = array<i64: 1, 8, 32>}, {pipeline_mode = #tpu.pipeline_mode<synchronous>, transform_indices = @transform_1, window_bounds = array<i64: 1, 32>}, {pipeline_mode = #tpu.pipeline_mode<synchronous>, transform_indices = @transform_2, window_bounds = array<i64: 1, 32>}, {pipeline_mode = #tpu.pipeline_mode<synchronous>, transform_indices = @transform_3, window_bounds = array<i64: 32, 96>}, {pipeline_mode = #tpu.pipeline_mode<synchronous>, transform_indices = @transform_4, window_bounds = array<i64: 1, 96>}, {transform_indices = @transform_5, window_bounds = array<i64: 1, 8, 96>}]} {
    %c0 = arith.constant 0 : index
    %c0_0 = arith.constant 0 : index
    %c0_1 = arith.constant 0 : index
    %0 = vector.load %arg2[%c0, %c0_0, %c0_1] : memref<1x8x32xf32, #tpu.memory_space<vmem>>, vector<1x8x32xf32>
    %1 = vector.shape_cast %0 : vector<1x8x32xf32> to vector<8x32xf32>
    %cst = arith.constant dense<0.000000e+00> : vector<8xf32>
    %2 = vector.multi_reduction <add>, %1, %cst [1] : vector<8x32xf32> to vector<8xf32>
    %3 = vector.shape_cast %2 : vector<8xf32> to vector<8x1xf32>
    %cst_2 = arith.constant 3.200000e+01 : f32
    %4 = vector.broadcast %cst_2 : f32 to vector<8x1xf32>
    %5 = arith.divf %3, %4 : vector<8x1xf32>
    %6 = vector.broadcast %5 : vector<8x1xf32> to vector<8x32xf32>
    %7 = arith.subf %1, %6 : vector<8x32xf32>
    %8 = arith.mulf %7, %7 : vector<8x32xf32>
    %cst_3 = arith.constant dense<0.000000e+00> : vector<8xf32>
    %9 = vector.multi_reduction <add>, %8, %cst_3 [1] : vector<8x32xf32> to vector<8xf32>
    %10 = vector.shape_cast %9 : vector<8xf32> to vector<8x1xf32>
    %cst_4 = arith.constant 3.200000e+01 : f32
    %11 = vector.broadcast %cst_4 : f32 to vector<8x1xf32>
    %12 = arith.divf %10, %11 : vector<8x1xf32>
    %cst_5 = arith.constant 9.99999974E-6 : f32
    %13 = vector.broadcast %cst_5 : f32 to vector<8x1xf32>
    %14 = arith.addf %12, %13 : vector<8x1xf32>
    %15 = math.rsqrt %14 : vector<8x1xf32>
    %16 = vector.broadcast %15 : vector<8x1xf32> to vector<8x32xf32>
    %17 = arith.mulf %7, %16 : vector<8x32xf32>
    %c0_6 = arith.constant 0 : index
    %c0_7 = arith.constant 0 : index
    %18 = vector.load %arg3[%c0_6, %c0_7] : memref<1x32xf32, #tpu.memory_space<vmem>>, vector<1x32xf32>
    %19 = vector.broadcast %18 : vector<1x32xf32> to vector<8x32xf32>
    %20 = arith.mulf %17, %19 : vector<8x32xf32>
    %c0_8 = arith.constant 0 : index
    %c0_9 = arith.constant 0 : index
    %21 = vector.load %arg4[%c0_8, %c0_9] : memref<1x32xf32, #tpu.memory_space<vmem>>, vector<1x32xf32>
    %22 = vector.broadcast %21 : vector<1x32xf32> to vector<8x32xf32>
    %23 = arith.addf %20, %22 : vector<8x32xf32>
    %24 = arith.truncf %23 : vector<8x32xf32> to vector<8x32xbf16>
    %c0_10 = arith.constant 0 : index
    %c0_11 = arith.constant 0 : index
    %25 = vector.load %arg5[%c0_10, %c0_11] : memref<32x96xbf16, #tpu.memory_space<vmem>>, vector<32x96xbf16>
    %cst_12 = arith.constant dense<0.000000e+00> : vector<8x96xf32>
    %26 = tpu.matmul %24, %25, %cst_12 {dimension_numbers = #tpu.dot_dimension_numbers<[1], [0], [0], [1], [0, 0, 1, 1], [], []>} : vector<8x32xbf16>, vector<32x96xbf16>, vector<8x96xf32> -> vector<8x96xf32>
    %c0_13 = arith.constant 0 : index
    %c0_14 = arith.constant 0 : index
    %27 = vector.load %arg6[%c0_13, %c0_14] : memref<1x96xf32, #tpu.memory_space<vmem>>, vector<1x96xf32>
    %28 = vector.broadcast %27 : vector<1x96xf32> to vector<8x96xf32>
    %29 = arith.addf %26, %28 : vector<8x96xf32>
    %30 = arith.truncf %29 : vector<8x96xf32> to vector<8x96xbf16>
    %c0_15 = arith.constant 0 : index
    %c0_16 = arith.constant 0 : index
    %c0_17 = arith.constant 0 : index
    %31 = vector.load %arg7[%c0_15, %c0_16, %c0_17] : memref<1x8x96xbf16, #tpu.memory_space<vmem>>, vector<1x8x96xbf16>
    %32 = vector.shape_cast %31 : vector<1x8x96xbf16> to vector<8x96xbf16>
    %33 = vector.shape_cast %30 : vector<8x96xbf16> to vector<1x8x96xbf16>
    tpu.vector_store %arg7[%c0_15, %c0_16, %c0_17], %33 {strides = array<i32>} : memref<1x8x96xbf16, #tpu.memory_space<vmem>>, vector<1x8x96xbf16>,
    return
  }
  func.func @transform_0(%arg0: i32, %arg1: i32) -> (i32, i32, i32) {
    %c0_i32 = arith.constant 0 : i32
    %c0_i32_0 = arith.constant 0 : i32
    return %arg0, %arg1, %c0_i32 : i32, i32, i32
  }
  func.func @transform_1(%arg0: i32, %arg1: i32) -> (i32, i32) {
    %c0_i32 = arith.constant 0 : i32
    %c0_i32_0 = arith.constant 0 : i32
    %c0_i32_1 = arith.constant 0 : i32
    return %c0_i32, %c0_i32_0 : i32, i32
  }
  func.func @transform_2(%arg0: i32, %arg1: i32) -> (i32, i32) {
    %c0_i32 = arith.constant 0 : i32
    %c0_i32_0 = arith.constant 0 : i32
    %c0_i32_1 = arith.constant 0 : i32
    return %c0_i32, %c0_i32_0 : i32, i32
  }
  func.func @transform_3(%arg0: i32, %arg1: i32) -> (i32, i32) {
    %c0_i32 = arith.constant 0 : i32
    %c0_i32_0 = arith.constant 0 : i32
    %c0_i32_1 = arith.constant 0 : i32
    return %c0_i32, %c0_i32_0 : i32, i32
  }
  func.func @transform_4(%arg0: i32, %arg1: i32) -> (i32, i32) {
    %c0_i32 = arith.constant 0 : i32
    %c0_i32_0 = arith.constant 0 : i32
    %c0_i32_1 = arith.constant 0 : i32
    return %c0_i32, %c0_i32_0 : i32, i32
  }
  func.func @transform_5(%arg0: i32, %arg1: i32) -> (i32, i32, i32) {
    %c0_i32 = arith.constant 0 : i32
    %c0_i32_0 = arith.constant 0 : i32
    return %arg0, %arg1, %c0_i32 : i32, i32, i32
  }
}

</mosaic_0001>

<bundles_post_ra>
// kernel: tpu_custom_call.1
= control target key start
LH: loop header
LB: loop body
LE: loop exit
PB: predicated region body
PF: predicated region fallthrough
CT: control target
= control target key end

     0   :  { %s1068_s0 = inlined_call_operand.hbm [shape: f32[2,32,32], index: 0, kind: input, shape index: {}]   ;;  %s1069_s1 = inlined_call_operand.vmem [shape: f32[1,32], index: 1, kind: input, shape index: {}]   ;;  %s1070_s2 = inlined_call_operand.vmem [shape: f32[1,32], index: 2, kind: input, shape index: {}]   ;;  %s1071_s3 = inlined_call_operand.hbm [shape: bf16[32,96], index: 3, kind: input, shape index: {}]   ;;  %s1072_s4 = inlined_call_operand.vmem [shape: f32[1,96], index: 4, kind: input, shape index: {}]   ;;  %s1073_s5 = inlined_call_operand.hbm [shape: bf16[2,32,96], index: 5, kind: output, shape index: {}]  }
   0x1   :  { %1084 = sst [smem:[#allocation15_spill]] %s1071_s3 }
   0x2   :  { %1085 = sst [smem:[#allocation16_spill]] %s1073_s5 }
   0x3   :  { %10 = vsyncpa [#allocation3], 0 }
   0x4   :  { %12 = vsyncpa [#allocation3 + $0x1], 0 }
   0x5   :  { %13 = vsyncpa [#allocation6], 0 }
   0x6   :  { %14 = vsyncpa [#allocation4], 0 }
   0x7   :  { %16 = vsyncpa [#allocation4 + $0x1], 0  ;;  %s817_s18 = smov 0   ;;  %s819_s19 = smov 0  }
   0x8   :  { %s821_s20 = smov 0   ;;  %s823_s21 = smov 0  }
   0x9   :  { %s825_s22 = smov 0   ;;  %s827_s23 = smov 0  }
   0xa   :  { %s829_s24 = smov 0   ;;  %s831_s25 = smov 0  }
   0xb LB: > { %1086 = sst [smem:[#allocation11_spill]] %s750_s18  ;;  %s487_s26 = sadd.s32 4294967295, %s778_s25   ;;  %s778_s25 = sphi %s831_s25, %s22_s25   ;;  %s774_s24 = sphi %s829_s24, %s1117_s24   ;;  %s770_s23 = sphi %s827_s23, %s1116_s23   ;;  %s766_s22 = sphi %s825_s22, %s1115_s22   ;;  %s762_s21 = sphi %s823_s21, %s1114_s21   ;;  %s758_s20 = sphi %s821_s20, %s1113_s20   ;;  %s754_s19 = sphi %s819_s19, %s1112_s19   ;;  %s750_s18 = sphi %s817_s18, %s1111_s18  }
   0xc   : > { %s488_s27 = sadd.s32 4294967294, %s778_s25   ;;  %p56_p0 = scmp.ne.s32.totalorder %s754_s19, %s750_s18 }
   0xd   : > { %p861_p1 = scmp.eq.s32.totalorder %s487_s26, 0  ;;  %p865_p2 = scmp.eq.s32.totalorder %s487_s26, 7 }
   0xe   : > { %p172_p3 = scmp.eq.s32.totalorder %s488_s27, 7  ;;  %p489_p5 = scmp.ge.s32.totalorder %s778_s25, 1 }
   0xf   : > { %s1087_s28 = scalar_select %p861_p1, 1, 0 }
  0x10   : > { %s1088_s29 = scalar_select %p865_p2, 1, 0 }
  0x11   : > { %p871_p4 = por %p861_p1, %p56_p0  ;;  %p876_p6 = por %p172_p3, %p56_p0 }
  0x12   : > { %p179_p7 = scmp.lt.s32.totalorder %s778_s25, 9  ;;  %s780_s8 = smov [#allocation5]  }
  0x13   : > { %s1089_s30 = scalar_select %p871_p4, 1, 0 }
  0x14   : > { %s1090_s6 = scalar_select %p876_p6, 1, 0 }
  0x15   : > { %p881_p8 = pnand %p489_p5, %p179_p7  ;;  %s197_s9 = sshll.u32 %s780_s8, 4  ;;  %s198_s9 = int_to_ptr.vmem [resolvable:$true] %s197_s9 }
  0x16   : > { %1091 = sst [smem:[#allocation12_spill]] %s1090_s6  ;;  %s1094_s3 = sld [smem:[#allocation15_spill]] }
  0x17   : > { %s1092_s7 = scalar_select %p881_p8, 1, 0 }
  0x18   : > { %p529_p9 = pneg %p881_p8 }
  0x1a   : > { %p889_p10 = pnand %p529_p9, %p861_p1 }
  0x1c   : > { %s618_s13 = scalar_lea.hbm %s1094_s3, 256  ;;  %p620_p12 = pneg %p889_p10 }
  0x1d   : > { %p619_p11 = scmp.ne.s32.totalorder %s1094_s3, %s618_s13  ;;  %p625_p3 = scmp.lt.u32.totalorder %s618_s13, %s1094_s3 }
  0x1f   : > { %p621_p13 = pnand %p620_p12, %p619_p11 }
  0x21   : > { %p622_p0 = pneg %p621_p13 }
  0x23   : > { %p627_p5 = pnand %p625_p3, %p622_p0 }
  0x25   : > { %630 = shalt.err (!%p627_p5)
}
  0x26   : > { %s631_s26 = scalar_lea.vmem %s198_s9, 256  ;;  %p639_p1 = scmp.lt.s32.totalorder %s198_s9, %s198_s9 }
  0x27   : > { %p632_p7 = scmp.ne.s32.totalorder %s198_s9, %s631_s26  ;;  %p640_p4 = scmp.lt.s32.totalorder %s631_s26, %s631_s26 }
  0x29   : > { %p634_p9 = pnand %p632_p7, %p620_p12  ;;  %p641_p8 = por %p640_p4, %p639_p1 }
  0x2b   : > { %p635_p6 = pneg %p634_p9 }
  0x2d   : > { %p642_p2 = pnand %p641_p8, %p635_p6 }
  0x2f   : > { %645 = shalt.err (!%p642_p2)
}
  0x30   : > { %s781_s27 = smov 64   ;;  %s782_s8 = smov 4  }
  0x31   : > { %532 = dma.hbm_to_vmem [thread:$0]  (!%p889_p10), %s1094_s3, 256, %s198_s9, [#allocation6], %s781_s27, %s781_s27, %s782_s8  }
  0x32   : > { %s31_s13 = sadd.s32 1, %s770_s23  ;;  %s34_s14 = sadd.s32 1, %s774_s24 }
  0x33   : > { %p32_p1 = scmp.ge.s32.totalorder %s31_s13, 4  ;;  %s43_s15 = sadd.s32 1, %s758_s20 }
  0x34   : > { %p50_p2 = scmp.ne.s32.totalorder %s758_s20, %s754_s19  ;;  %p51_p4 = scmp.eq.s32.totalorder %s778_s25, 0 }
  0x35   : > { %s1119_s13 = smov (%p32_p1, %s31_s13), 0  ;;  %s1121_s14 = smov (!%p32_p1, %s34_s14), %s774_s24 }
  0x36   : > { %1095 = sst [smem:[#allocation13_spill]] %s1119_s13  ;;  %s39_s16 = ssub.s32 %s770_s23, %s1119_s13 }
  0x37   : > { %p36_p6 = scmp.ge.s32.totalorder %s1121_s14, 2  ;;  %p1096_p8 = scmp.ne.s32.totalorder %s1088_s29, 0 }
  0x38   : > { %p926_p10 = por %p51_p4, %p50_p2  ;;  %p542_p12 = scmp.lt.s32.totalorder %s778_s25, 8 }
  0x39   : > { %p922_p11 = por %p1096_p8, %p50_p2  ;;  %s1123_s14 = smov (%p36_p6, %s1121_s14), 0 }
  0x3a   : > { %s214_s17 = sand.u32 1, %s758_s20   ;;  %s493_s26 = sshll.u32 %s774_s24, 2 }
  0x3b   : > { %s1097_s10 = scalar_select %p922_p11, 1, 0 }
  0x3c   : > { %s38_s27 = ssub.s32 %s774_s24, %s1123_s14  ;;  %s492_s11 = sshll.u32 %s214_s17, 3 }
  0x3d   : > { %1098 = sst [smem:[#allocation14_spill]] %s1097_s10  ;;  %s40_s8 = sor.u32 %s39_s16, %s38_s27 }
  0x3e   : > { %p41_p13 = scmp.eq.s32.totalorder %s40_s8, 0  ;;  %s223_s29 = sadd.s32 %s770_s23, %s493_s26 }
  0x3f   : > { %s218_s12 = scalar_lea.vmem [#allocation2], %s492_s11  ;;  %s494_s6 = sshll.u32 %s223_s29, 7 }
  0x40   : > { %s227_s3 = sshll.u32 %s218_s12, 4  ;;  %s946_s10 = scalar_lea.hbm %s1068_s0, %s494_s6  ;;  %s941_s3 = int_to_ptr.vmem [resolvable:$true] %s227_s3 }
  0x41   : > { %s939_s13 = scalar_select %p41_p13, %s758_s20, %s43_s15  }
  0x42   : > { %p952_p0 = pnand %p542_p12, %p926_p10  ;;  %s215_s15 = scalar_lea.sflag [#allocation3], %s214_s17 }
  0x43   : > { %s646_s26 = scalar_lea.hbm %s946_s10, 128  ;;  %s651_s6 = scalar_lea.hbm %s1068_s0, 1024 }
  0x44   : > { %p647_p3 = scmp.ne.s32.totalorder %s946_s10, %s646_s26  ;;  %p648_p5 = pneg %p952_p0 }
  0x45   : > { %p652_p1 = scmp.lt.u32.totalorder %s946_s10, %s1068_s0  ;;  %p653_p2 = scmp.lt.u32.totalorder %s651_s6, %s646_s26 }
  0x46   : > { %p649_p7 = pnand %p648_p5, %p647_p3  ;;  %p655_p6 = scmp.lt.u32.totalorder %s646_s26, %s946_s10 }
  0x47   : > { %p654_p4 = por %p653_p2, %p652_p1 }
  0x48   : > { %p650_p9 = pneg %p649_p7 }
  0x49   : > { %p656_p8 = por %p655_p6, %p654_p4 }
  0x4b   : > { %p657_p10 = pnand %p656_p8, %p650_p9 }
  0x4d   : > { %660 = shalt.err (!%p657_p10)
}
  0x4e   : > { %s661_s17 = scalar_lea.vmem %s941_s3, 128  ;;  %s783_s8 = smov [#allocation2]  }
  0x4f   : > { %p662_p12 = scmp.ne.s32.totalorder %s941_s3, %s661_s17  ;;  %s666_s11 = sshll.u32 %s783_s8, 4  ;;  %s667_s11 = int_to_ptr.vmem [resolvable:$false] %s666_s11 }
  0x50   : > { %s668_s29 = scalar_lea.vmem %s667_s11, 256  ;;  %p669_p7 = scmp.lt.s32.totalorder %s941_s3, %s667_s11 }
  0x51   : > { %p664_p13 = pnand %p662_p12, %p648_p5  ;;  %p670_p1 = scmp.lt.s32.totalorder %s668_s29, %s661_s17 }
  0x53   : > { %p665_p3 = pneg %p664_p13  ;;  %p671_p2 = por %p670_p1, %p669_p7 }
  0x55   : > { %p672_p4 = pnand %p671_p2, %p665_p3 }
  0x57   : > { %675 = shalt.err (!%p672_p4)
}
  0x58   : > { %536 = dma.hbm_to_vmem [thread:$0]  (!%p952_p0), %s946_s10, 128, %s941_s3, %s215_s15  }
  0x59   : > { %p1101_p9 = scmp.ne.s32.totalorder %s1092_s7, 0 }
  0x5a   : > { %s984_s12 = sand.u32 (!%p1101_p9), 1, %s754_s19   ;;  %p1102_p5 = scmp.ne.s32.totalorder (!%p1101_p9), %s1089_s30, 0 }
  0x5b   : > { %236 = sbr.rel (%p1101_p9) target bundleno = 648 (0x288), region = 40  ;;  %s496_s26 = sshll.u32 (!%p1101_p9), %s984_s12, 3 }
  0x5c   : > { %s239_s5 = scalar_lea.sflag (!%p1101_p9), [#allocation3], %s984_s12  ;;  %s242_s18 = scalar_lea.vmem (!%p1101_p9), [#allocation2], %s496_s26 }
  0x62   : > { %737 = dma.done.wait (%p1102_p5), %s239_s5, 128  }
  0x63   : > { %739 = vsyncadd (%p1102_p5), %s239_s5, 4294967168  ;;  %p1103_p6 = scmp.ne.s32.totalorder %s1087_s28, 0 }
  0x65   : > { %741 = dma.done.wait (%p1103_p6), [#allocation6], 256  }
  0x66   : > { %743 = vsyncadd (%p1103_p6), [#allocation6], 4294967040  ;;  %vm275_vm0 = vcmask 261120   ;;  %v274_v0 = vld [vmem:[%s242_s18] sm:$0xff]  ;;  %v614_v7 = vld [vmem:[#allocation5] sm:$0xff]   ;;  %v784_v8 = vmov 0.0  }
  0x67   : > { %v276_v1 = vsel %vm275_vm0, %v274_v0, 0.0  ;;  %513 = vmatprep.subr.bf16.mxu0 %v784_v8  ;;  %v615_v9 = vld [vmem:[#allocation5 + $0x8] sm:$0xff]   ;;  %vm785_vm1 = vmmov 0   ;;  %v499_v14 = vld [vmem:[%s1069_s1] ss:$0 sm:$0xff]  ;;  %s498_s10 = sshll.u32 %s984_s12, 2 }
  0x68   : > { %277 = vadd.xlane.f32.xlu0 %v276_v1  ;;  %514 = vmatpush3.bf16.msra.mxu0 %v614_v7  ;;  %v500_v16 = vld [vmem:[%s1070_s2] ss:$0 sm:$0xff]  ;;  %s506_s16 = sshll.u32 %s766_s22, 2  ;;  %s272_s8 = scalar_lea.vmem [#allocation7], %s498_s10  ;;  %vm374_vm2 = vcmask 781312  }
  0x69   : > { %517 = vmatprep.mubr.msk.bf16.mxu0 %vm785_vm1, %v784_v8  ;;  %515 = vmatprep.subr.bf16.mxu0 %v784_v8  ;;  %s388_s15 = sadd.s32 %s762_s21, %s506_s16  ;;  %v501_v20 = vld [vmem:[%s1072_s4] ss:$0 sm:$0xff]  ;;  %s392_s11 = sshll.u32 %s272_s8, 4  ;;  %s1016_s11 = int_to_ptr.vmem [resolvable:$true] %s392_s11 }
  0x6a   : > { %s507_s17 = sshll.u32 %s388_s15, 6  ;;  %s1105_s22 = sld [smem:[#allocation16_spill]] }
  0x6b   : > { %s377_s21 = scalar_lea.sflag [#allocation4], %s984_s12  ;;  %s676_s3 = scalar_lea.vmem %s1016_s11, 64 }
  0x6c   : > { %516 = vmatpush3.bf16.msra.mxu0 %v615_v9  ;;  %p677_p0 = scmp.ne.s32.totalorder %s1016_s11, %s676_s3  ;;  %s786_s28 = smov [#allocation7]  }
  0x6d   : > { %s680_s30 = sshll.u32 %s786_s28, 4  ;;  %s681_s30 = int_to_ptr.vmem [resolvable:$false] %s680_s30 }
  0x6e   : > { %p678_p8 = pnand %p677_p0, %p922_p11  ;;  %s682_s7 = scalar_lea.vmem %s681_s30, 128 }
  0x6f   : > { %p683_p12 = scmp.lt.s32.totalorder %s1016_s11, %s681_s30  ;;  %p684_p13 = scmp.lt.s32.totalorder %s682_s7, %s676_s3 }
  0x70   : > { %s1106_s5 = smov %s1105_s22  ;;  %s1014_s18 = scalar_lea.hbm %s1105_s22, %s507_s17 }
  0x71   : > { %p679_p10 = pneg %p678_p8  ;;  %p685_p3 = por %p684_p13, %p683_p12 }
  0x73   : > { %p686_p7 = pnand %p685_p3, %p679_p10 }
  0xf5   : > { %v278_v2 = vpop.xlane.xlu0 %277 }
  0xf6   : > { %v280_v3 = vmul.f32 0.03125, %v278_v2 }
  0xf8   : > { %v281_v4 = vsub.f32 %v274_v0, %v280_v3 }
  0xfa   : > { %v282_v5 = vmul.f32 %v281_v4, %v281_v4 }
  0xfc   : > { %v283_v6 = vsel %vm275_vm0, %v282_v5, 0.0 }
  0xfd   : > { %284 = vadd.xlane.f32.xlu0 %v283_v6 }
 0x18a   : > { %v285_v10 = vpop.xlane.xlu0 %284 }
 0x18b   : > { %v286_v11 = vmul.f32 0.03125, %v285_v10 }
 0x18d   : > { %v287_v12 = vadd.f32 1e-05, %v286_v11 }
 0x18f   : > { %616 = vrsqrt.f32 %v287_v12 }
 0x199   : > { %v617_v13 = vpop.eup %616 }
 0x19a   : > { %v289_v15 = vmul.f32 %v617_v13, %v281_v4 }
 0x19c   : > { %v297_v17 = vmul.f32 %v499_v14, %v289_v15 }
 0x19e   : > { %v305_v18 = vadd.f32 %v500_v16, %v297_v17 }
 0x1a0   : > { %v306_v19 = vpack.c.bf16 %v305_v18, %v305_v18 }
 0x1a2   : > { %518 = vmatmul.mubr.msk.bf16.vlgmr.msra.gmra.mrb[0].mxu0 %vm275_vm0, %v306_v19 }
 0x275   : > { %v367_v21 = vpop.f32.mrb[0].mxu0 }
 0x276   : > { %v368_v22 = vadd.f32 %v501_v20, %v367_v21  ;;  %v519_v23 = vpop.f32.mrb[1].mxu0 }
 0x277   : > { %v370_v24 = vpop.f32.mrb[2].mxu0 }
 0x278   : > { %v373_v25 = vpack.c.bf16 %v368_v22, %v368_v22  ;;  %v520_v26 = vpop.f32.mrb[3].mxu0 }
 0x27a   : > { %375 = vst.msk [vmem:[%s272_s8] sm:$0xf] %vm374_vm2, %v373_v25 }
 0x27b   : > { %689 = shalt.err (!%p686_p7)
}
 0x27c   : > { %s690_s12 = scalar_lea.hbm %s1014_s18, 64  ;;  %s694_s15 = scalar_lea.hbm %s1106_s5, 512 }
 0x27d   : > { %p691_p1 = scmp.ne.s32.totalorder %s1014_s18, %s690_s12  ;;  %p695_p9 = scmp.lt.u32.totalorder %s1014_s18, %s1106_s5 }
 0x27e   : > { %p696_p5 = scmp.lt.u32.totalorder %s694_s15, %s690_s12  ;;  %p698_p0 = scmp.lt.u32.totalorder %s690_s12, %s1014_s18 }
 0x27f   : > { %p692_p2 = pnand %p691_p1, %p922_p11 }
 0x280   : > { %p697_p6 = por %p696_p5, %p695_p9 }
 0x281   : > { %p693_p4 = pneg %p692_p2 }
 0x282   : > { %p699_p8 = por %p698_p0, %p697_p6 }
 0x284   : > { %p700_p10 = pnand %p699_p8, %p693_p4 }
 0x286   : > { %703 = shalt.err (!%p700_p10)
}
 0x287   : > { %527 = dma.vmem_to_hbm [thread:$0]  (%p922_p11), %s1016_s11, 64, %s1014_s18, %s377_s21  }
 0x288 PF: > { %s1107_s17 = sld [smem:[#allocation11_spill]]  ;;  %s1108_s8 = sld [smem:[#allocation12_spill]] }
 0x289   : > { %p544_p12 = scmp.ge.s32.totalorder %s778_s25, 2 }
 0x28e   : > { %s404_s29 = sand.u32 1, %s1107_s17   ;;  %p1109_p13 = scmp.ne.s32.totalorder %s1108_s8, 0 }
 0x28f   : > { %s405_s26 = scalar_lea.sflag [#allocation4], %s404_s29 }
 0x290   : > { %p538_p3 = pnand %p544_p12, %p1109_p13 }
 0x292   : > { %745 = dma.done.wait (!%p538_p3), %s405_s26, 64  }
 0x293   : > { %747 = vsyncadd (!%p538_p3), %s405_s26, 4294967232  ;;  %s22_s25 = sadd.s32 1, %s778_s25   ;;  %s1110_s27 = sld [smem:[#allocation13_spill]] }
 0x294   : > { %p19_p7 = scmp.ge.s32.totalorder %s22_s25, 10   ;;  %s1111_s18 = smov %s754_s19 }
 0x295   : > { %s1112_s19 = smov %s758_s20  ;;  %s1113_s20 = smov %s939_s13 }
 0x296   : > { %s1114_s21 = smov %s770_s23  ;;  %s1115_s22 = smov %s774_s24 }
 0x297   : > { %s1117_s24 = smov %s1123_s14  ;;  %21 = sbr.rel (!%p19_p7) target bundleno = 11 (0xb), region = 89 }
 0x299   : > { %s1116_s23 = smov %s1110_s27 }
 0x29e   :  { %410 = vsyncpa [#allocation3], 1 }
 0x29f   :  { %412 = vsyncpa [#allocation3 + $0x1], 1 }
 0x2a0   :  { %413 = vsyncpa [#allocation6], 1 }
 0x2a1   :  { %414 = vsyncpa [#allocation4], 1 }
 0x2a2   :  { %416 = vsyncpa [#allocation4 + $0x1], 1 }

// kernel: tpu_custom_call.1
= control target key start
LH: loop header
LB: loop body
LE: loop exit
PB: predicated region body
PF: predicated region fallthrough
CT: control target
= control target key end

     0   :  { %s1068_s0 = inlined_call_operand.hbm [shape: f32[2,32,32], index: 0, kind: input, shape index: {}]   ;;  %s1069_s1 = inlined_call_operand.vmem [shape: f32[1,32], index: 1, kind: input, shape index: {}]   ;;  %s1070_s2 = inlined_call_operand.vmem [shape: f32[1,32], index: 2, kind: input, shape index: {}]   ;;  %s1071_s3 = inlined_call_operand.hbm [shape: bf16[32,96], index: 3, kind: input, shape index: {}]   ;;  %s1072_s4 = inlined_call_operand.vmem [shape: f32[1,96], index: 4, kind: input, shape index: {}]   ;;  %s1073_s5 = inlined_call_operand.hbm [shape: bf16[2,32,96], index: 5, kind: output, shape index: {}]  }
   0x1   :  { %1084 = sst [smem:[#allocation15_spill]] %s1071_s3 }
   0x2   :  { %1085 = sst [smem:[#allocation16_spill]] %s1073_s5 }
   0x3   :  { %10 = vsyncpa [#allocation3], 0 }
   0x4   :  { %12 = vsyncpa [#allocation3 + $0x1], 0 }
   0x5   :  { %13 = vsyncpa [#allocation6], 0 }
   0x6   :  { %14 = vsyncpa [#allocation4], 0 }
   0x7   :  { %16 = vsyncpa [#allocation4 + $0x1], 0  ;;  %s817_s18 = smov 0   ;;  %s819_s19 = smov 0  }
   0x8   :  { %s821_s20 = smov 0   ;;  %s823_s21 = smov 0  }
   0x9   :  { %s825_s22 = smov 0   ;;  %s827_s23 = smov 0  }
   0xa   :  { %s829_s24 = smov 0   ;;  %s831_s25 = smov 0  }
   0xb LB: > { %1086 = sst [smem:[#allocation11_spill]] %s750_s18  ;;  %s487_s26 = sadd.s32 4294967295, %s778_s25   ;;  %s778_s25 = sphi %s831_s25, %s22_s25   ;;  %s774_s24 = sphi %s829_s24, %s1117_s24   ;;  %s770_s23 = sphi %s827_s23, %s1116_s23   ;;  %s766_s22 = sphi %s825_s22, %s1115_s22   ;;  %s762_s21 = sphi %s823_s21, %s1114_s21   ;;  %s758_s20 = sphi %s821_s20, %s1113_s20   ;;  %s754_s19 = sphi %s819_s19, %s1112_s19   ;;  %s750_s18 = sphi %s817_s18, %s1111_s18  }
   0xc   : > { %s488_s27 = sadd.s32 4294967294, %s778_s25   ;;  %p56_p0 = scmp.ne.s32.totalorder %s754_s19, %s750_s18 }
   0xd   : > { %p861_p1 = scmp.eq.s32.totalorder %s487_s26, 0  ;;  %p865_p2 = scmp.eq.s32.totalorder %s487_s26, 7 }
   0xe   : > { %p172_p3 = scmp.eq.s32.totalorder %s488_s27, 7  ;;  %p489_p5 = scmp.ge.s32.totalorder %s778_s25, 1 }
   0xf   : > { %s1087_s28 = scalar_select %p861_p1, 1, 0 }
  0x10   : > { %s1088_s29 = scalar_select %p865_p2, 1, 0 }
  0x11   : > { %p871_p4 = por %p861_p1, %p56_p0  ;;  %p876_p6 = por %p172_p3, %p56_p0 }
  0x12   : > { %p179_p7 = scmp.lt.s32.totalorder %s778_s25, 9  ;;  %s780_s8 = smov [#allocation5]  }
  0x13   : > { %s1089_s30 = scalar_select %p871_p4, 1, 0 }
  0x14   : > { %s1090_s6 = scalar_select %p876_p6, 1, 0 }
  0x15   : > { %p881_p8 = pnand %p489_p5, %p179_p7  ;;  %s197_s9 = sshll.u32 %s780_s8, 4  ;;  %s198_s9 = int_to_ptr.vmem [resolvable:$true] %s197_s9 }
  0x16   : > { %1091 = sst [smem:[#allocation12_spill]] %s1090_s6  ;;  %s1094_s3 = sld [smem:[#allocation15_spill]] }
  0x17   : > { %s1092_s7 = scalar_select %p881_p8, 1, 0 }
  0x18   : > { %p529_p9 = pneg %p881_p8 }
  0x1a   : > { %p889_p10 = pnand %p529_p9, %p861_p1 }
  0x1c   : > { %s618_s13 = scalar_lea.hbm %s1094_s3, 256  ;;  %p620_p12 = pneg %p889_p10 }
  0x1d   : > { %p619_p11 = scmp.ne.s32.totalorder %s1094_s3, %s618_s13  ;;  %p625_p3 = scmp.lt.u32.totalorder %s618_s13, %s1094_s3 }
  0x1f   : > { %p621_p13 = pnand %p620_p12, %p619_p11 }
  0x21   : > { %p622_p0 = pneg %p621_p13 }
  0x23   : > { %p627_p5 = pnand %p625_p3, %p622_p0 }
  0x25   : > { %630 = shalt.err (!%p627_p5)
}
  0x26   : > { %s631_s26 = scalar_lea.vmem %s198_s9, 256  ;;  %p639_p1 = scmp.lt.s32.totalorder %s198_s9, %s198_s9 }
  0x27   : > { %p632_p7 = scmp.ne.s32.totalorder %s198_s9, %s631_s26  ;;  %p640_p4 = scmp.lt.s32.totalorder %s631_s26, %s631_s26 }
  0x29   : > { %p634_p9 = pnand %p632_p7, %p620_p12  ;;  %p641_p8 = por %p640_p4, %p639_p1 }
  0x2b   : > { %p635_p6 = pneg %p634_p9 }
  0x2d   : > { %p642_p2 = pnand %p641_p8, %p635_p6 }
  0x2f   : > { %645 = shalt.err (!%p642_p2)
}
  0x30   : > { %s781_s27 = smov 64   ;;  %s782_s8 = smov 4  }
  0x31   : > { %532 = dma.hbm_to_vmem [thread:$0]  (!%p889_p10), %s1094_s3, 256, %s198_s9, [#allocation6], %s781_s27, %s781_s27, %s782_s8  }
  0x32   : > { %s31_s13 = sadd.s32 1, %s770_s23  ;;  %s34_s14 = sadd.s32 1, %s774_s24 }
  0x33   : > { %p32_p1 = scmp.ge.s32.totalorder %s31_s13, 4  ;;  %s43_s15 = sadd.s32 1, %s758_s20 }
  0x34   : > { %p50_p2 = scmp.ne.s32.totalorder %s758_s20, %s754_s19  ;;  %p51_p4 = scmp.eq.s32.totalorder %s778_s25, 0 }
  0x35   : > { %s1119_s13 = smov (%p32_p1, %s31_s13), 0  ;;  %s1121_s14 = smov (!%p32_p1, %s34_s14), %s774_s24 }
  0x36   : > { %1095 = sst [smem:[#allocation13_spill]] %s1119_s13  ;;  %s39_s16 = ssub.s32 %s770_s23, %s1119_s13 }
  0x37   : > { %p36_p6 = scmp.ge.s32.totalorder %s1121_s14, 2  ;;  %p1096_p8 = scmp.ne.s32.totalorder %s1088_s29, 0 }
  0x38   : > { %p926_p10 = por %p51_p4, %p50_p2  ;;  %p542_p12 = scmp.lt.s32.totalorder %s778_s25, 8 }
  0x39   : > { %p922_p11 = por %p1096_p8, %p50_p2  ;;  %s1123_s14 = smov (%p36_p6, %s1121_s14), 0 }
  0x3a   : > { %s214_s17 = sand.u32 1, %s758_s20   ;;  %s493_s26 = sshll.u32 %s774_s24, 2 }
  0x3b   : > { %s1097_s10 = scalar_select %p922_p11, 1, 0 }
  0x3c   : > { %s38_s27 = ssub.s32 %s774_s24, %s1123_s14  ;;  %s492_s11 = sshll.u32 %s214_s17, 3 }
  0x3d   : > { %1098 = sst [smem:[#allocation14_spill]] %s1097_s10  ;;  %s40_s8 = sor.u32 %s39_s16, %s38_s27 }
  0x3e   : > { %p41_p13 = scmp.eq.s32.totalorder %s40_s8, 0  ;;  %s223_s29 = sadd.s32 %s770_s23, %s493_s26 }
  0x3f   : > { %s218_s12 = scalar_lea.vmem [#allocation2], %s492_s11  ;;  %s494_s6 = sshll.u32 %s223_s29, 7 }
  0x40   : > { %s227_s3 = sshll.u32 %s218_s12, 4  ;;  %s946_s10 = scalar_lea.hbm %s1068_s0, %s494_s6  ;;  %s941_s3 = int_to_ptr.vmem [resolvable:$true] %s227_s3 }
  0x41   : > { %s939_s13 = scalar_select %p41_p13, %s758_s20, %s43_s15  }
  0x42   : > { %p952_p0 = pnand %p542_p12, %p926_p10  ;;  %s215_s15 = scalar_lea.sflag [#allocation3], %s214_s17 }
  0x43   : > { %s646_s26 = scalar_lea.hbm %s946_s10, 128  ;;  %s651_s6 = scalar_lea.hbm %s1068_s0, 1024 }
  0x44   : > { %p647_p3 = scmp.ne.s32.totalorder %s946_s10, %s646_s26  ;;  %p648_p5 = pneg %p952_p0 }
  0x45   : > { %p652_p1 = scmp.lt.u32.totalorder %s946_s10, %s1068_s0  ;;  %p653_p2 = scmp.lt.u32.totalorder %s651_s6, %s646_s26 }
  0x46   : > { %p649_p7 = pnand %p648_p5, %p647_p3  ;;  %p655_p6 = scmp.lt.u32.totalorder %s646_s26, %s946_s10 }
  0x47   : > { %p654_p4 = por %p653_p2, %p652_p1 }
  0x48   : > { %p650_p9 = pneg %p649_p7 }
  0x49   : > { %p656_p8 = por %p655_p6, %p654_p4 }
  0x4b   : > { %p657_p10 = pnand %p656_p8, %p650_p9 }
  0x4d   : > { %660 = shalt.err (!%p657_p10)
}
  0x4e   : > { %s661_s17 = scalar_lea.vmem %s941_s3, 128  ;;  %s783_s8 = smov [#allocation2]  }
  0x4f   : > { %p662_p12 = scmp.ne.s32.totalorder %s941_s3, %s661_s17  ;;  %s666_s11 = sshll.u32 %s783_s8, 4  ;;  %s667_s11 = int_to_ptr.vmem [resolvable:$false] %s666_s11 }
  0x50   : > { %s668_s29 = scalar_lea.vmem %s667_s11, 256  ;;  %p669_p7 = scmp.lt.s32.totalorder %s941_s3, %s667_s11 }
  0x51   : > { %p664_p13 = pnand %p662_p12, %p648_p5  ;;  %p670_p1 = scmp.lt.s32.totalorder %s668_s29, %s661_s17 }
  0x53   : > { %p665_p3 = pneg %p664_p13  ;;  %p671_p2 = por %p670_p1, %p669_p7 }
  0x55   : > { %p672_p4 = pnand %p671_p2, %p665_p3 }
  0x57   : > { %675 = shalt.err (!%p672_p4)
}
  0x58   : > { %536 = dma.hbm_to_vmem [thread:$0]  (!%p952_p0), %s946_s10, 128, %s941_s3, %s215_s15  }
  0x59   : > { %p1101_p9 = scmp.ne.s32.totalorder %s1092_s7, 0 }
  0x5a   : > { %s984_s12 = sand.u32 (!%p1101_p9), 1, %s754_s19   ;;  %p1102_p5 = scmp.ne.s32.totalorder (!%p1101_p9), %s1089_s30, 0 }
  0x5b   : > { %236 = sbr.rel (%p1101_p9) target bundleno = 648 (0x288), region = 40  ;;  %s496_s26 = sshll.u32 (!%p1101_p9), %s984_s12, 3 }
  0x5c   : > { %s239_s5 = scalar_lea.sflag (!%p1101_p9), [#allocation3], %s984_s12  ;;  %s242_s18 = scalar_lea.vmem (!%p1101_p9), [#allocation2], %s496_s26 }
  0x62   : > { %737 = dma.done.wait (%p1102_p5), %s239_s5, 128  }
  0x63   : > { %739 = vsyncadd (%p1102_p5), %s239_s5, 4294967168  ;;  %p1103_p6 = scmp.ne.s32.totalorder %s1087_s28, 0 }
  0x65   : > { %741 = dma.done.wait (%p1103_p6), [#allocation6], 256  }
  0x66   : > { %743 = vsyncadd (%p1103_p6), [#allocation6], 4294967040  ;;  %vm275_vm0 = vcmask 261120   ;;  %v274_v0 = vld [vmem:[%s242_s18] sm:$0xff]  ;;  %v614_v7 = vld [vmem:[#allocation5] sm:$0xff]   ;;  %v784_v8 = vmov 0.0  }
  0x67   : > { %v276_v1 = vsel %vm275_vm0, %v274_v0, 0.0  ;;  %513 = vmatprep.subr.bf16.mxu0 %v784_v8  ;;  %v615_v9 = vld [vmem:[#allocation5 + $0x8] sm:$0xff]   ;;  %vm785_vm1 = vmmov 0   ;;  %v499_v14 = vld [vmem:[%s1069_s1] ss:$0 sm:$0xff]  ;;  %s498_s10 = sshll.u32 %s984_s12, 2 }
  0x68   : > { %277 = vadd.xlane.f32.xlu0 %v276_v1  ;;  %514 = vmatpush3.bf16.msra.mxu0 %v614_v7  ;;  %v500_v16 = vld [vmem:[%s1070_s2] ss:$0 sm:$0xff]  ;;  %s506_s16 = sshll.u32 %s766_s22, 2  ;;  %s272_s8 = scalar_lea.vmem [#allocation7], %s498_s10  ;;  %vm374_vm2 = vcmask 781312  }
  0x69   : > { %517 = vmatprep.mubr.msk.bf16.mxu0 %vm785_vm1, %v784_v8  ;;  %515 = vmatprep.subr.bf16.mxu0 %v784_v8  ;;  %s388_s15 = sadd.s32 %s762_s21, %s506_s16  ;;  %v501_v20 = vld [vmem:[%s1072_s4] ss:$0 sm:$0xff]  ;;  %s392_s11 = sshll.u32 %s272_s8, 4  ;;  %s1016_s11 = int_to_ptr.vmem [resolvable:$true] %s392_s11 }
  0x6a   : > { %s507_s17 = sshll.u32 %s388_s15, 6  ;;  %s1105_s22 = sld [smem:[#allocation16_spill]] }
  0x6b   : > { %s377_s21 = scalar_lea.sflag [#allocation4], %s984_s12  ;;  %s676_s3 = scalar_lea.vmem %s1016_s11, 64 }
  0x6c   : > { %516 = vmatpush3.bf16.msra.mxu0 %v615_v9  ;;  %p677_p0 = scmp.ne.s32.totalorder %s1016_s11, %s676_s3  ;;  %s786_s28 = smov [#allocation7]  }
  0x6d   : > { %s680_s30 = sshll.u32 %s786_s28, 4  ;;  %s681_s30 = int_to_ptr.vmem [resolvable:$false] %s680_s30 }
  0x6e   : > { %p678_p8 = pnand %p677_p0, %p922_p11  ;;  %s682_s7 = scalar_lea.vmem %s681_s30, 128 }
  0x6f   : > { %p683_p12 = scmp.lt.s32.totalorder %s1016_s11, %s681_s30  ;;  %p684_p13 = scmp.lt.s32.totalorder %s682_s7, %s676_s3 }
  0x70   : > { %s1106_s5 = smov %s1105_s22  ;;  %s1014_s18 = scalar_lea.hbm %s1105_s22, %s507_s17 }
  0x71   : > { %p679_p10 = pneg %p678_p8  ;;  %p685_p3 = por %p684_p13, %p683_p12 }
  0x73   : > { %p686_p7 = pnand %p685_p3, %p679_p10 }
  0xf5   : > { %v278_v2 = vpop.xlane.xlu0 %277 }
  0xf6   : > { %v280_v3 = vmul.f32 0.03125, %v278_v2 }
  0xf8   : > { %v281_v4 = vsub.f32 %v274_v0, %v280_v3 }
  0xfa   : > { %v282_v5 = vmul.f32 %v281_v4, %v281_v4 }
  0xfc   : > { %v283_v6 = vsel %vm275_vm0, %v282_v5, 0.0 }
  0xfd   : > { %284 = vadd.xlane.f32.xlu0 %v283_v6 }
 0x18a   : > { %v285_v10 = vpop.xlane.xlu0 %284 }
 0x18b   : > { %v286_v11 = vmul.f32 0.03125, %v285_v10 }
 0x18d   : > { %v287_v12 = vadd.f32 1e-05, %v286_v11 }
 0x18f   : > { %616 = vrsqrt.f32 %v287_v12 }
 0x199   : > { %v617_v13 = vpop.eup %616 }
 0x19a   : > { %v289_v15 = vmul.f32 %v617_v13, %v281_v4 }
 0x19c   : > { %v297_v17 = vmul.f32 %v499_v14, %v289_v15 }
 0x19e   : > { %v305_v18 = vadd.f32 %v500_v16, %v297_v17 }
 0x1a0   : > { %v306_v19 = vpack.c.bf16 %v305_v18, %v305_v18 }
 0x1a2   : > { %518 = vmatmul.mubr.msk.bf16.vlgmr.msra.gmra.mrb[0].mxu0 %vm275_vm0, %v306_v19 }
 0x275   : > { %v367_v21 = vpop.f32.mrb[0].mxu0 }
 0x276   : > { %v368_v22 = vadd.f32 %v501_v20, %v367_v21  ;;  %v519_v23 = vpop.f32.mrb[1].mxu0 }
 0x277   : > { %v370_v24 = vpop.f32.mrb[2].mxu0 }
 0x278   : > { %v373_v25 = vpack.c.bf16 %v368_v22, %v368_v22  ;;  %v520_v26 = vpop.f32.mrb[3].mxu0 }
 0x27a   : > { %375 = vst.msk [vmem:[%s272_s8] sm:$0xf] %vm374_vm2, %v373_v25 }
 0x27b   : > { %689 = shalt.err (!%p686_p7)
}
 0x27c   : > { %s690_s12 = scalar_lea.hbm %s1014_s18, 64  ;;  %s694_s15 = scalar_lea.hbm %s1106_s5, 512 }
 0x27d   : > { %p691_p1 = scmp.ne.s32.totalorder %s1014_s18, %s690_s12  ;;  %p695_p9 = scmp.lt.u32.totalorder %s1014_s18, %s1106_s5 }
 0x27e   : > { %p696_p5 = scmp.lt.u32.totalorder %s694_s15, %s690_s12  ;;  %p698_p0 = scmp.lt.u32.totalorder %s690_s12, %s1014_s18 }
 0x27f   : > { %p692_p2 = pnand %p691_p1, %p922_p11 }
 0x280   : > { %p697_p6 = por %p696_p5, %p695_p9 }
 0x281   : > { %p693_p4 = pneg %p692_p2 }
 0x282   : > { %p699_p8 = por %p698_p0, %p697_p6 }
 0x284   : > { %p700_p10 = pnand %p699_p8, %p693_p4 }
 0x286   : > { %703 = shalt.err (!%p700_p10)
}
 0x287   : > { %527 = dma.vmem_to_hbm [thread:$0]  (%p922_p11), %s1016_s11, 64, %s1014_s18, %s377_s21  }
 0x288 PF: > { %s1107_s17 = sld [smem:[#allocation11_spill]]  ;;  %s1108_s8 = sld [smem:[#allocation12_spill]] }
 0x289   : > { %p544_p12 = scmp.ge.s32.totalorder %s778_s25, 2 }
 0x28e   : > { %s404_s29 = sand.u32 1, %s1107_s17   ;;  %p1109_p13 = scmp.ne.s32.totalorder %s1108_s8, 0 }
 0x28f   : > { %s405_s26 = scalar_lea.sflag [#allocation4], %s404_s29 }
 0x290   : > { %p538_p3 = pnand %p544_p12, %p1109_p13 }
 0x292   : > { %745 = dma.done.wait (!%p538_p3), %s405_s26, 64  }
 0x293   : > { %747 = vsyncadd (!%p538_p3), %s405_s26, 4294967232  ;;  %s22_s25 = sadd.s32 1, %s778_s25   ;;  %s1110_s27 = sld [smem:[#allocation13_spill]] }
 0x294   : > { %p19_p7 = scmp.ge.s32.totalorder %s22_s25, 10   ;;  %s1111_s18 = smov %s754_s19 }
 0x295   : > { %s1112_s19 = smov %s758_s20  ;;  %s1113_s20 = smov %s939_s13 }
 0x296   : > { %s1114_s21 = smov %s770_s23  ;;  %s1115_s22 = smov %s774_s24 }
 0x297   : > { %s1117_s24 = smov %s1123_s14  ;;  %21 = sbr.rel (!%p19_p7) target bundleno = 11 (0xb), region = 89 }
 0x299   : > { %s1116_s23 = smov %s1110_s27 }
 0x29e   :  { %410 = vsyncpa [#allocation3], 1 }
 0x29f   :  { %412 = vsyncpa [#allocation3 + $0x1], 1 }
 0x2a0   :  { %413 = vsyncpa [#allocation6], 1 }
 0x2a1   :  { %414 = vsyncpa [#allocation4], 1 }
 0x2a2   :  { %416 = vsyncpa [#allocation4 + $0x1], 1 }

</bundles_post_ra>
